<compile_context>
chip_gen: v5e
topology: v5e:2x2
jax: 0.10.0
libtpu: 0.0.40
codegen_flags: <defaults>
</compile_context>

<pallas_src>
import functools
import numpy as np
import jax
import jax.numpy as jnp
from jax.experimental import pallas as pl
from jax.experimental.pallas import tpu as pltpu


def _rup(x, m):
    return ((x + m - 1) // m) * m


# ----------------------------------------------------------------------------
# Pallas kernels
# ----------------------------------------------------------------------------

def _matmul_kernel(*refs, act, use_res, n_valid):
    """Tiled matmul with fused bias / residual / activation epilogue."""
    if use_res:
        a_ref, b_ref, bias_ref, res_ref, o_ref, acc_ref = refs
    else:
        a_ref, b_ref, bias_ref, o_ref, acc_ref = refs
        res_ref = None
    k = pl.program_id(2)

    @pl.when(k == 0)
    def _():
        acc_ref[...] = jnp.zeros_like(acc_ref)

    # bf16 x bf16 -> f32 accumulate (native MXU path).
    acc_ref[...] += jnp.dot(a_ref[...], b_ref[...],
                            preferred_element_type=jnp.float32)

    @pl.when(k == pl.num_programs(2) - 1)
    def _():
        out = acc_ref[...] + bias_ref[...]
        if use_res:
            out = out + res_ref[...]
        if act == "relu":
            out = jnp.maximum(out, 0.0)
        elif act == "sigmoid":
            out = jax.nn.sigmoid(out)
        elif act == "softmax":
            # Softmax over the real N lanes of this (single) N tile; padded
            # lanes are masked to a huge negative so exp() underflows to 0.
            lane = jax.lax.broadcasted_iota(jnp.int32, out.shape, 1)
            x = jnp.where(lane < n_valid, out, jnp.float32(-1e30))
            m = jnp.max(x, axis=-1, keepdims=True)
            e = jnp.exp(x - m)
            out = e / jnp.sum(e, axis=-1, keepdims=True)
        o_ref[...] = out.astype(o_ref.dtype)


def matmul_pallas(a, b, bias, act="none", residual=None):
    """(M,K) @ (K,N) + bias[N] (+ residual[M,N]) with fused activation.

    A and B are fed to the MXU in bf16; accumulation / epilogue in f32.
    """
    M, K = a.shape
    K2, N = b.shape
    assert K == K2

    # Adaptive tiles: few, large grid steps (per-step overhead dominates on
    # this tiny network).  All sizes keep VMEM well under default limits.
    tm = min(_rup(max(M, 1), 8), 256)
    kp128 = _rup(K, 128)
    tk = kp128 if kp128 <= 2048 else 512          # single K step when possible
    tn = min(_rup(N, 128), 256)
    if act == "softmax":
        tn = _rup(N, 128)                         # whole row in one N tile

    Mp, Kp, Np = _rup(M, tm), _rup(K, tk), _rup(N, tn)
    if act == "softmax":
        assert Np == tn, "fused softmax needs a single N tile"

    a_p = jnp.pad(a.astype(jnp.bfloat16), ((0, Mp - M), (0, Kp - K)))
    b_p = jnp.pad(b.astype(jnp.bfloat16), ((0, Kp - K), (0, Np - N)))
    bias_p = jnp.pad(bias.astype(jnp.float32), (0, Np - N)).reshape(1, Np)
    use_res = residual is not None

    inputs = [a_p, b_p, bias_p]
    in_specs = [
        pl.BlockSpec((tm, tk), lambda i, j, k: (i, k)),
        pl.BlockSpec((tk, tn), lambda i, j, k: (k, j)),
        pl.BlockSpec((1, tn), lambda i, j, k: (0, j)),
    ]
    if use_res:
        inputs.append(jnp.pad(residual.astype(jnp.float32),
                              ((0, Mp - M), (0, Np - N))))
        in_specs.append(pl.BlockSpec((tm, tn), lambda i, j, k: (i, j)))

    kernel = functools.partial(_matmul_kernel, act=act, use_res=use_res,
                               n_valid=N)
    out = pl.pallas_call(
        kernel,
        out_shape=jax.ShapeDtypeStruct((Mp, Np), jnp.float32),
        grid_spec=pltpu.PrefetchScalarGridSpec(
            num_scalar_prefetch=0,
            grid=(Mp // tm, Np // tn, Kp // tk),
            in_specs=in_specs,
            out_specs=pl.BlockSpec((tm, tn), lambda i, j, k: (i, j)),
            scratch_shapes=[pltpu.VMEM((tm, tn), jnp.float32)],
        ),
        compiler_params=pltpu.CompilerParams(
            dimension_semantics=("parallel", "parallel", "arbitrary")),
    )(*inputs)
    return out[:M, :N]


def _max_kernel(x_ref, o_ref):
    o_ref[...] = jnp.max(x_ref[...], axis=1)


def maxpool3x3s2p1_pallas(x):
    """MaxPool2d(kernel=3, stride=2, padding=1) on NHWC."""
    B, H, W, C = x.shape
    Ho = (H + 2 - 3) // 2 + 1
    Wo = (W + 2 - 3) // 2 + 1
    xp = jnp.pad(x, ((0, 0), (1, 1), (1, 1), (0, 0)),
                 constant_values=-jnp.inf)
    pats = jnp.stack([xp[:, dy:dy + 2 * Ho:2, dx:dx + 2 * Wo:2, :]
                      for dy in range(3) for dx in range(3)], axis=3)
    M = B * Ho * Wo
    pats = pats.reshape(M, 9, C)
    tm = min(_rup(M, 8), 256)
    Mp = _rup(M, tm)
    pats_p = jnp.pad(pats, ((0, Mp - M), (0, 0), (0, 0)))
    out = pl.pallas_call(
        _max_kernel,
        out_shape=jax.ShapeDtypeStruct((Mp, C), jnp.float32),
        grid_spec=pltpu.PrefetchScalarGridSpec(
            num_scalar_prefetch=0, grid=(Mp // tm,),
            in_specs=[pl.BlockSpec((tm, 9, C), lambda i: (i, 0, 0))],
            out_specs=pl.BlockSpec((tm, C), lambda i: (i, 0))),
        compiler_params=pltpu.CompilerParams(dimension_semantics=("parallel",)),
    )(pats_p)
    return out[:M].reshape(B, Ho, Wo, C)


def _lcau_combine_kernel(p_ref, a_ref, o_ref):
    # p: (tp, 25, C) bf16 neighborhood patches, a: (tp, 25, 1) f32 attention.
    # out[n, c] = sum_k p[n, k, c] * a[n, k]   (single pass over the 25 taps)
    p = p_ref[...].astype(jnp.float32)
    a = a_ref[...]
    o_ref[...] = jnp.sum(p * a, axis=1)


def lcau_combine_pallas(patches, attn):
    """patches (P,25,C) bf16, attn (P,25,1) f32 -> (P,C) f32."""
    P, KK, C = patches.shape
    bytes_per_row = KK * C * 2 + KK * 4 + C * 4
    raw = min(256, (1 << 20) // max(bytes_per_row, 1))
    tp = max(8, (raw // 8) * 8)
    Pp = _rup(P, tp)
    patches_p = jnp.pad(patches, ((0, Pp - P), (0, 0), (0, 0)))
    attn_p = jnp.pad(attn, ((0, Pp - P), (0, 0), (0, 0)))
    out = pl.pallas_call(
        _lcau_combine_kernel,
        out_shape=jax.ShapeDtypeStruct((Pp, C), jnp.float32),
        grid_spec=pltpu.PrefetchScalarGridSpec(
            num_scalar_prefetch=0, grid=(Pp // tp,),
            in_specs=[pl.BlockSpec((tp, 25, C), lambda i: (i, 0, 0)),
                      pl.BlockSpec((tp, 25, 1), lambda i: (i, 0, 0))],
            out_specs=pl.BlockSpec((tp, C), lambda i: (i, 0))),
        compiler_params=pltpu.CompilerParams(dimension_semantics=("parallel",)),
    )(patches_p, attn_p)
    return out[:P]


# ----------------------------------------------------------------------------
# Glue: im2col conv wrapper, nearest upsample
# ----------------------------------------------------------------------------

def conv2d_pallas(x, w, b, stride=1, padding=0, act="none", residual=None):
    """x: NHWC, w: torch-layout (O, I, KH, KW), b: (O,)."""
    O, I, KH, KW = w.shape
    B, H, W_, C = x.shape
    assert C == I
    Ho = (H + 2 * padding - KH) // stride + 1
    Wo = (W_ + 2 * padding - KW) // stride + 1
    xb = x.astype(jnp.bfloat16)                       # im2col buffer in bf16
    if KH == 1 and KW == 1 and padding == 0:
        xs = xb[:, ::stride, ::stride, :] if stride != 1 else xb
        a = xs.reshape(B * Ho * Wo, C)
    else:
        xp = jnp.pad(xb, ((0, 0), (padding, padding), (padding, padding), (0, 0)))
        cols = jnp.stack(
            [xp[:, dy:dy + stride * Ho:stride, dx:dx + stride * Wo:stride, :]
             for dy in range(KH) for dx in range(KW)], axis=3)
        a = cols.reshape(B * Ho * Wo, KH * KW * C)
    wm = jnp.transpose(w, (2, 3, 1, 0)).reshape(KH * KW * I, O)
    res2d = residual.reshape(B * Ho * Wo, O) if residual is not None else None
    out = matmul_pallas(a, wm, b, act=act, residual=res2d)
    return out.reshape(B, Ho, Wo, O)


def upsample2_nearest(x):
    x = jnp.repeat(x, 2, axis=1)
    x = jnp.repeat(x, 2, axis=2)
    return x


# ----------------------------------------------------------------------------
# Model blocks
# ----------------------------------------------------------------------------

def basic_block_forward(x, p):
    """Standard ResNet BasicBlock (eval-mode BN folded into the convs)."""
    stride = p["stride"]
    out = conv2d_pallas(x, p["w1f"], p["b1f"], stride=stride, padding=1,
                        act="relu")
    if "wdf" in p:
        res = conv2d_pallas(x, p["wdf"], p["bdf"], stride=stride, padding=0)
    else:
        res = x
    out = conv2d_pallas(out, p["w2f"], p["b2f"], stride=1, padding=1,
                        residual=res, act="relu")
    return out


def lcau_forward(x, p, residual=None, final_sigmoid=False):
    """LCAU_Block (l=5, r=2), 2x spatial upsampling content-aware block.

    Exact algebraic simplifications of the reference forward:
      * per-pixel softmax over the 25 kernel channels commutes with the
        nearest 2x upsample, so it is applied pre-upsample (fused into the
        conv1 matmul epilogue);
      * nearest upsample + unfold(2, step=2) makes the 4 sub-pixel attention
        columns identical, so the per-pixel (C,25)@(25,4) matmul is a single
        (25,)-weighted neighborhood sum and the 4-way channel repeat
        (channel layout c*4+j) is folded into the 1x1 conv2 weights.
    """
    B, H, W, C = x.shape
    # conv1 + fused 25-way channel softmax -> per-pixel attention weights
    attn = conv2d_pallas(x, p["w1"], p["b1"], stride=1, padding=1,
                         act="softmax")                       # (B,H,W,25)
    # 5x5 zero-padded neighborhoods of x (bf16 to halve the patch traffic)
    xp = jnp.pad(x.astype(jnp.bfloat16), ((0, 0), (2, 2), (2, 2), (0, 0)))
    pats = jnp.stack([xp[:, dy:dy + H, dx:dx + W, :]
                      for dy in range(5) for dx in range(5)], axis=3)
    pats = pats.reshape(B * H * W, 25, C)
    comb = lcau_combine_pallas(pats, attn.reshape(B * H * W, 25, 1))
    comb = comb.reshape(B, H, W, C)
    # Fold the interleaved 4-way channel repeat into conv2: w2_eff[:,c] =
    # sum_j w2[:, c*4+j].  Then nearest-upsample and apply the 1x1 conv with
    # the skip-connection add (and final sigmoid, for lcau4) fused in the
    # matmul epilogue.
    w2_eff = p["w2"].reshape(p["w2"].shape[0], C, 4, 1, 1).sum(axis=2)
    z = upsample2_nearest(comb)                               # (B,2H,2W,C)
    out = conv2d_pallas(z, w2_eff, p["b2"], stride=1, padding=0,
                        residual=residual,
                        act="sigmoid" if final_sigmoid else "none")
    return out


def rsca_resnet_forward(x_nchw, params):
    x = jnp.transpose(x_nchw, (0, 2, 3, 1)).astype(jnp.float32)  # NCHW->NHWC
    # stem: 7x7/2 conv + BN + ReLU, then 3x3/2 maxpool
    x = conv2d_pallas(x, params["stem_w"], params["stem_b"],
                      stride=2, padding=3, act="relu")
    x = maxpool3x3s2p1_pallas(x)
    x1 = x
    for p in params["layer1"]:
        x1 = basic_block_forward(x1, p)
    x2 = x1
    for p in params["layer2"]:
        x2 = basic_block_forward(x2, p)
    x3 = x2
    for p in params["layer3"]:
        x3 = basic_block_forward(x3, p)
    x4 = x3
    for p in params["layer4"]:
        x4 = basic_block_forward(x4, p)
    y = lcau_forward(x4, params["lcau1"], residual=x3)     # x += x3
    y = lcau_forward(y, params["lcau2"], residual=x2)      # x += x2
    y = lcau_forward(y, params["lcau3"], residual=x1)      # x += x1
    y = lcau_forward(y, params["lcau4"], residual=None,
                     final_sigmoid=True)                   # sigmoid fused
    y = upsample2_nearest(y)       # sigmoid commutes with nearest upsample
    return jnp.transpose(y, (0, 3, 1, 2))                  # back to NCHW


# ----------------------------------------------------------------------------
# Deterministic synthetic parameters
# ----------------------------------------------------------------------------

def _conv_w(key, o, i, kh, kw):
    fan_in = i * kh * kw
    return (jax.random.normal(key, (o, i, kh, kw), jnp.float32)
            / np.sqrt(fan_in))


def _bn(key, c):
    k1, k2, k3, k4 = jax.random.split(key, 4)
    return dict(
        gamma=1.0 + 0.1 * jax.random.normal(k1, (c,), jnp.float32),
        beta=0.1 * jax.random.normal(k2, (c,), jnp.float32),
        mean=0.1 * jax.random.normal(k3, (c,), jnp.float32),
        var=1.0 + 0.1 * jnp.abs(jax.random.normal(k4, (c,), jnp.float32)),
    )


def _fold_bn(w, b, bn, eps=1e-5):
    scale = bn["gamma"] / jnp.sqrt(bn["var"] + eps)
    wf = w * scale[:, None, None, None]
    bf = (b - bn["mean"]) * scale + bn["beta"]
    return wf, bf


def _basic_block_params(key, inplanes, planes, stride):
    keys = jax.random.split(key, 8)
    w1f, b1f = _fold_bn(_conv_w(keys[0], planes, inplanes, 3, 3),
                        jnp.zeros((planes,), jnp.float32), _bn(keys[1], planes))
    w2f, b2f = _fold_bn(_conv_w(keys[2], planes, planes, 3, 3),
                        jnp.zeros((planes,), jnp.float32), _bn(keys[3], planes))
    p = dict(w1f=w1f, b1f=b1f, w2f=w2f, b2f=b2f, stride=stride)
    if stride != 1 or inplanes != planes:
        wd = _conv_w(keys[4], planes, inplanes, 1, 1)
        bd = 0.01 * jax.random.normal(keys[5], (planes,), jnp.float32)
        wdf, bdf = _fold_bn(wd, bd, _bn(keys[6], planes))
        p.update(wdf=wdf, bdf=bdf)
    return p


def init_params(key):
    keys = jax.random.split(key, 32)
    ki = iter(keys)
    params = {}
    # conv1 = Conv2d(3,64,7,2,3) + BN + ReLU
    w = _conv_w(next(ki), 64, 3, 7, 7)
    b = 0.01 * jax.random.normal(next(ki), (64,), jnp.float32)
    params["stem_w"], params["stem_b"] = _fold_bn(w, b, _bn(next(ki), 64))
    # ResNet-18 layers: BasicBlock, layers=[2,2,2,2]
    cfg = [(64, 64, 1), (64, 128, 2), (128, 256, 2), (256, 512, 2)]
    for li, (inp, planes, stride) in enumerate(cfg, start=1):
        blocks = [_basic_block_params(next(ki), inp, planes, stride),
                  _basic_block_params(next(ki), planes, planes, 1)]
        params[f"layer{li}"] = blocks
    # LCAU blocks (in_ch -> out_ch)
    lcau_cfg = [(512, 256), (256, 128), (128, 64), (64, 1)]
    for i, (cin, cout) in enumerate(lcau_cfg, start=1):
        k1, k2, k3, k4 = jax.random.split(next(ki), 4)
        params[f"lcau{i}"] = dict(
            w1=_conv_w(k1, 25, cin, 3, 3),
            b1=0.01 * jax.random.normal(k2, (25,), jnp.float32),
            w2=_conv_w(k3, cout, 4 * cin, 1, 1),
            b2=0.01 * jax.random.normal(k4, (cout,), jnp.float32),
        )
    return params


# ----------------------------------------------------------------------------

if __name__ == "__main__":
    root = jax.random.PRNGKey(0)
    params = init_params(root)
    x = jax.random.normal(jax.random.fold_in(root, 12345),
                          (2, 3, 64, 64), jnp.float32)   # NCHW input
    y = rsca_resnet_forward(x, params)
    y = jax.block_until_ready(y)
    assert y.shape == (2, 1, 64, 64), y.shape
    assert bool(jnp.all(jnp.isfinite(y)))
    assert bool(jnp.all((y >= 0.0) & (y <= 1.0)))        # sigmoid output range
    print("KERNEL_OK")
</pallas_src>

<mosaic_0001>
module attributes {stable_mosaic.version = 11 : i64} {
  func.func @_matmul_kernel(%arg0: i32, %arg1: i32, %arg2: i32, %arg3: memref<256x256xbf16, #tpu.memory_space<vmem>>, %arg4: memref<256x128xbf16, #tpu.memory_space<vmem>>, %arg5: memref<1x128xf32, #tpu.memory_space<vmem>>, %arg6: memref<256x128xf32, #tpu.memory_space<vmem>>, %arg7: memref<256x128xf32, #tpu.memory_space<vmem>>) attributes {dimension_semantics = [#tpu.dimension_semantics<parallel>, #tpu.dimension_semantics<parallel>, #tpu.dimension_semantics<arbitrary>], iteration_bounds = array<i64: 8, 1, 1>, scalar_prefetch = 0 : i64, scratch_operands = 1 : i64, tpu.core_type = #tpu.core_type<tc>, window_params = [{transform_indices = @transform_0, window_bounds = array<i64: 256, 256>}, {transform_indices = @transform_1, window_bounds = array<i64: 256, 128>}, {transform_indices = @transform_2, window_bounds = array<i64: 1, 128>}, {transform_indices = @transform_3, window_bounds = array<i64: 256, 128>}]} {
    %c0_i32 = arith.constant 0 : i32
    %0 = arith.cmpi eq, %arg2, %c0_i32 : i32
    %1 = arith.extui %0 : i1 to i32
    %c0_i32_0 = arith.constant 0 : i32
    %2 = arith.cmpi ne, %1, %c0_i32_0 : i32
    scf.if %2 {
      %cst_10 = arith.constant 0.000000e+00 : f32
      %12 = vector.broadcast %cst_10 : f32 to vector<256x128xf32>
      %c0_11 = arith.constant 0 : index
      %c0_12 = arith.constant 0 : index
      %13 = vector.load %arg7[%c0_11, %c0_12] : memref<256x128xf32, #tpu.memory_space<vmem>>, vector<256x128xf32>
      tpu.vector_store %arg7[%c0_11, %c0_12], %12 {strides = array<i32>} : memref<256x128xf32, #tpu.memory_space<vmem>>, vector<256x128xf32>,
    } else {
    }
    %c0 = arith.constant 0 : index
    %c0_1 = arith.constant 0 : index
    %3 = vector.load %arg7[%c0, %c0_1] : memref<256x128xf32, #tpu.memory_space<vmem>>, vector<256x128xf32>
    %c0_2 = arith.constant 0 : index
    %c0_3 = arith.constant 0 : index
    %4 = vector.load %arg3[%c0_2, %c0_3] : memref<256x256xbf16, #tpu.memory_space<vmem>>, vector<256x256xbf16>
    %c0_4 = arith.constant 0 : index
    %c0_5 = arith.constant 0 : index
    %5 = vector.load %arg4[%c0_4, %c0_5] : memref<256x128xbf16, #tpu.memory_space<vmem>>, vector<256x128xbf16>
    %cst = arith.constant dense<0.000000e+00> : vector<256x128xf32>
    %6 = tpu.matmul %4, %5, %cst {dimension_numbers = #tpu.dot_dimension_numbers<[1], [0], [0], [1], [0, 0, 1, 1], [], []>} : vector<256x256xbf16>, vector<256x128xbf16>, vector<256x128xf32> -> vector<256x128xf32>
    %7 = arith.addf %3, %6 : vector<256x128xf32>
    %c0_6 = arith.constant 0 : index
    %c0_7 = arith.constant 0 : index
    %8 = vector.load %arg7[%c0_6, %c0_7] : memref<256x128xf32, #tpu.memory_space<vmem>>, vector<256x128xf32>
    tpu.vector_store %arg7[%c0_6, %c0_7], %7 {strides = array<i32>} : memref<256x128xf32, #tpu.memory_space<vmem>>, vector<256x128xf32>,
    %c0_i32_8 = arith.constant 0 : i32
    %9 = arith.cmpi eq, %arg2, %c0_i32_8 : i32
    %10 = arith.extui %9 : i1 to i32
    %c0_i32_9 = arith.constant 0 : i32
    %11 = arith.cmpi ne, %10, %c0_i32_9 : i32
    scf.if %11 {
      %c0_10 = arith.constant 0 : index
      %c0_11 = arith.constant 0 : index
      %12 = vector.load %arg7[%c0_10, %c0_11] : memref<256x128xf32, #tpu.memory_space<vmem>>, vector<256x128xf32>
      %c0_12 = arith.constant 0 : index
      %c0_13 = arith.constant 0 : index
      %13 = vector.load %arg5[%c0_12, %c0_13] : memref<1x128xf32, #tpu.memory_space<vmem>>, vector<1x128xf32>
      %14 = vector.broadcast %13 : vector<1x128xf32> to vector<256x128xf32>
      %15 = arith.addf %12, %14 : vector<256x128xf32>
      %cst_14 = arith.constant 0.000000e+00 : f32
      %16 = vector.broadcast %cst_14 : f32 to vector<256x128xf32>
      %17 = arith.maximumf %15, %16 : vector<256x128xf32>
      %c0_15 = arith.constant 0 : index
      %c0_16 = arith.constant 0 : index
      %18 = vector.load %arg6[%c0_15, %c0_16] : memref<256x128xf32, #tpu.memory_space<vmem>>, vector<256x128xf32>
      tpu.vector_store %arg6[%c0_15, %c0_16], %17 {strides = array<i32>} : memref<256x128xf32, #tpu.memory_space<vmem>>, vector<256x128xf32>,
    } else {
    }
    return
  }
  func.func @transform_0(%arg0: i32, %arg1: i32, %arg2: i32) -> (i32, i32) {
    %c0_i32 = arith.constant 0 : i32
    return %arg0, %arg2 : i32, i32
  }
  func.func @transform_1(%arg0: i32, %arg1: i32, %arg2: i32) -> (i32, i32) {
    %c0_i32 = arith.constant 0 : i32
    return %arg2, %arg1 : i32, i32
  }
  func.func @transform_2(%arg0: i32, %arg1: i32, %arg2: i32) -> (i32, i32) {
    %c0_i32 = arith.constant 0 : i32
    %c0_i32_0 = arith.constant 0 : i32
    return %c0_i32, %arg1 : i32, i32
  }
  func.func @transform_3(%arg0: i32, %arg1: i32, %arg2: i32) -> (i32, i32) {
    %c0_i32 = arith.constant 0 : i32
    return %arg0, %arg1 : i32, i32
  }
}

</mosaic_0001>

<bundles_post_ra>
// kernel: tpu_custom_call.1
= control target key start
LH: loop header
LB: loop body
LE: loop exit
PB: predicated region body
PF: predicated region fallthrough
CT: control target
= control target key end

     0   :  { %s1982_s0 = inlined_call_operand.hbm [shape: bf16[2048,256], index: 0, kind: input, shape index: {}]   ;;  %s1983_s1 = inlined_call_operand.hbm [shape: bf16[256,128], index: 1, kind: input, shape index: {}]   ;;  %s1984_s2 = inlined_call_operand.vmem [shape: f32[1,128], index: 2, kind: input, shape index: {}]   ;;  %s1985_s3 = inlined_call_operand.hbm [shape: f32[2048,128], index: 3, kind: output, shape index: {}]  }
   0x1   :  { %1986 = sst [smem:[#allocation12_spill]] %s1983_s1 }
   0x2   :  { %8 = vsyncpa [#allocation4], 0 }
   0x3   :  { %10 = vsyncpa [#allocation4 + $0x1], 0 }
   0x4   :  { %11 = vsyncpa [#allocation7], 0 }
   0x5   :  { %12 = vsyncpa [#allocation5], 0 }
   0x6   :  { %14 = vsyncpa [#allocation5 + $0x1], 0  ;;  %s1693_s12 = smov 0   ;;  %s1695_s13 = smov 0  }
   0x7   :  { %s1697_s14 = smov 0   ;;  %s1699_s15 = smov 0  }
   0x8   :  { %s1701_s16 = smov 0   ;;  %s1703_s17 = smov 0  }
   0x9 LB: > { %s1160_s18 = sadd.s32 4294967295, %s1664_s17   ;;  %s1161_s19 = sadd.s32 4294967294, %s1664_s17   ;;  %s1664_s17 = sphi %s1703_s17, %s20_s17   ;;  %s1660_s16 = sphi %s1701_s16, %s1999_s16   ;;  %s1656_s15 = sphi %s1699_s15, %s1998_s15   ;;  %s1652_s14 = sphi %s1697_s14, %s1997_s14   ;;  %s1648_s13 = sphi %s1695_s13, %s1996_s13   ;;  %s1644_s12 = sphi %s1693_s12, %s1995_s12  }
   0xa   : > { %p61_p0 = scmp.ne.s32.totalorder %s1648_s13, %s1644_s12  ;;  %p1727_p1 = scmp.eq.s32.totalorder %s1160_s18, 0 }
   0xb   : > { %p1731_p2 = scmp.eq.s32.totalorder %s1160_s18, 7  ;;  %p147_p3 = scmp.eq.s32.totalorder %s1161_s19, 7 }
   0xc   : > { %p1737_p4 = por %p1727_p1, %p61_p0  ;;  %p1162_p5 = scmp.ge.s32.totalorder %s1664_s17, 1 }
   0xd   : > { %p1742_p6 = por %p147_p3, %p61_p0  ;;  %p154_p7 = scmp.lt.s32.totalorder %s1664_s17, 9 }
   0xe   : > { %s1991_s1 = sld [smem:[#allocation12_spill]]  ;;  %s1666_s28 = smov [#allocation6]  }
   0xf   : > { %p1750_p8 = pnand %p1162_p5, %p154_p7  ;;  %s171_s29 = sshll.u32 %s1666_s28, 4  ;;  %s172_s29 = int_to_ptr.vmem [resolvable:$true] %s171_s29 }
  0x10   : > { %s1667_s30 = smov 64   ;;  %s1668_s4 = smov 4  }
  0x11   : > { %p1446_p9 = pneg %p1750_p8  ;;  %s39_s5 = sadd.s32 1, %s1660_s16 }
  0x12   : > { %p41_p11 = scmp.ge.s32.totalorder %s39_s5, 8  ;;  %s48_s6 = sadd.s32 1, %s1652_s14 }
  0x13   : > { %p1447_p10 = pnand %p1446_p9, %p1727_p1  ;;  %p55_p12 = scmp.ne.s32.totalorder %s1652_s14, %s1648_s13 }
  0x14   : > { %s169_s26 = sshll.u32 %s1991_s1, 4  ;;  %p56_p13 = scmp.eq.s32.totalorder %s1664_s17, 0  ;;  %s170_s26 = int_to_ptr.hbm [resolvable:$true] %s169_s26 }
  0x15   : > { %1449 = dma.hbm_to_vmem [thread:$0]  (!%p1447_p10), %s170_s26, 2048, %s172_s29, [#allocation7], %s1667_s30, %s1667_s30, %s1668_s4  }
  0x16   : > { %s2001_s5 = smov (%p41_p11, %s39_s5), 0  ;;  %p1765_p0 = por %p56_p13, %p55_p12 }
  0x17   : > { %p1771_p3 = por %p1731_p2, %p55_p12  ;;  %s43_s9 = ssub.s32 %s1660_s16, %s2001_s5 }
  0x18   : > { %p1459_p5 = scmp.lt.s32.totalorder %s1664_s17, 8  ;;  %p46_p7 = scmp.eq.s32.totalorder %s43_s9, 0 }
  0x19   : > { %s191_s10 = sand.u32 1, %s1652_s14   ;;  %s1372_s19 = sshll.u32 %s1660_s16, 8 }
  0x1a   : > { %s1166_s11 = sshll.u32 %s191_s10, 8  ;;  %s203_s26 = scalar_lea.hbm %s1982_s0, %s1372_s19 }
  0x1b   : > { %s1780_s18 = scalar_select %p46_p7, %s1652_s14, %s48_s6  }
  0x1c   : > { %s195_s28 = scalar_lea.vmem [#allocation3], %s1166_s11  ;;  %s204_s21 = sshll.u32 %s203_s26, 4  ;;  %s205_s21 = int_to_ptr.hbm [resolvable:$true] %s204_s21 }
  0x1d   : > { %s206_s29 = sshll.u32 %s195_s28, 4  ;;  %p1451_p2 = pnand %p1459_p5, %p1765_p0  ;;  %s207_s29 = int_to_ptr.vmem [resolvable:$true] %s206_s29 }
  0x1e   : > { %s192_s30 = scalar_lea.sflag [#allocation4], %s191_s10  ;;  %s1669_s4 = smov 128  }
  0x1f   : > { %s1670_s1 = smov 8   ;;  %218 = sbr.rel (%p1750_p8) target bundleno = 334 (0x14e), region = 32 }
  0x20   : > { %1453 = dma.hbm_to_vmem [thread:$0]  (!%p1451_p2), %s205_s21, 4096, %s207_s29, %s192_s30, %s1669_s4, %s1669_s4, %s1670_s1  }
  0x21   : > { %s1791_s6 = sand.u32 (!%p1750_p8), 1, %s1648_s13  }
  0x22   : > { %s1171_s9 = sshll.u32 (!%p1750_p8), %s1791_s6, 8  ;;  %s221_s11 = scalar_lea.sflag (!%p1750_p8), [#allocation4], %s1791_s6 }
  0x23   : > { %s1797_s19 = scalar_lea.vmem (!%p1750_p8), [#allocation3], %s1171_s9 }
  0x24   : > { %1631 = dma.done.wait (%p1737_p4), %s221_s11, 4096  }
  0x25   : > { %1633 = vsyncadd (%p1737_p4), %s221_s11, 4294963200 }
  0x26   : > { %1635 = dma.done.wait (%p1727_p1), [#allocation7], 2048  }
  0x27   : > { %1637 = vsyncadd (%p1727_p1), [#allocation7], 4294965248  ;;  %v1412_v0 = vld [vmem:[#allocation6 + $0x38] sm:$0xff]  ;;  %v1411_v2 = vld [vmem:[#allocation6 + $0x30] sm:$0xff]  ;;  %s1879_s22 = scalar_lea.vmem [#allocation8], %s1171_s9  ;;  %s1421_s27 = sshll.u32 %s1656_s15, 8 }
  0x28   : > { %v1420_v1 = vld [vmem:[#allocation6 + $0x78] sm:$0xff]  ;;  %651 = vmatpush.bf16.msra.mxu0 %v1412_v0  ;;  %1422 = vmatpush.bf16.msra.mxu2 %v1412_v0  ;;  %v1419_v3 = vld [vmem:[#allocation6 + $0x70] sm:$0xff]  ;;  %v1410_v4 = vld [vmem:[#allocation6 + $0x28] sm:$0xff]  ;;  %s1041_s24 = scalar_lea.hbm %s1985_s3, %s1421_s27  ;;  %s1042_s25 = sshll.u32 %s1879_s22, 4  ;;  %s1043_s25 = int_to_ptr.vmem [resolvable:$true] %s1042_s25 }
  0x29   : > { %740 = vmatpush.bf16.msra.mxu1 %v1420_v1  ;;  %1430 = vmatpush.bf16.msra.mxu3 %v1420_v1  ;;  %v1418_v5 = vld [vmem:[#allocation6 + $0x68] sm:$0xff]  ;;  %v1409_v6 = vld [vmem:[#allocation6 + $0x20] sm:$0xff]  ;;  %v1408_v8 = vld [vmem:[#allocation6 + $0x18] sm:$0xff]  ;;  %s1044_s26 = sshll.u32 %s1041_s24, 4  ;;  %s1029_s15 = scalar_lea.sflag [#allocation5], %s1791_s6  ;;  %s1045_s26 = int_to_ptr.hbm [resolvable:$true] %s1044_s26 }
  0x2a   : > { %v1417_v7 = vld [vmem:[#allocation6 + $0x60] sm:$0xff]  ;;  %v1416_v9 = vld [vmem:[#allocation6 + $0x58] sm:$0xff]  ;;  %v1407_v10 = vld [vmem:[#allocation6 + $0x10] sm:$0xff]  ;;  %s1592_s28 = sshra.s32 %s1045_s26, 4  ;;  %s1598_s4 = scalar_lea.hbm %s1985_s3, 2048  ;;  %s1593_s28 = int_to_ptr.hbm [resolvable:$true] %s1592_s28 }
  0x2b   : > { %v1415_v11 = vld [vmem:[#allocation6 + $0x50] sm:$0xff]  ;;  %v1406_v12 = vld [vmem:[#allocation6 + $0x8] sm:$0xff]  ;;  %v1405_v14 = vld [vmem:[#allocation6] sm:$0xff]  ;;  %s1594_s29 = scalar_lea.hbm %s1593_s28, 256  ;;  %p1599_p9 = scmp.lt.s32.totalorder %s1593_s28, %s1985_s3 }
  0x2c   : > { %652 = vmatpush.bf16.msra.mxu0 %v1411_v2  ;;  %1423 = vmatpush.bf16.msra.mxu2 %v1411_v2  ;;  %v1414_v13 = vld [vmem:[#allocation6 + $0x48] sm:$0xff]  ;;  %v1413_v15 = vld [vmem:[#allocation6 + $0x40] sm:$0xff]  ;;  %v1184_v28 = vld [vmem:[%s1797_s19 + $0x10] sm:$0xf]  ;;  %p1595_p1 = scmp.ne.s32.totalorder %s1593_s28, %s1594_s29  ;;  %p1600_p10 = scmp.lt.s32.totalorder %s1598_s4, %s1594_s29 }
  0x2d   : > { %741 = vmatpush.bf16.msra.mxu1 %v1419_v3  ;;  %1431 = vmatpush.bf16.msra.mxu3 %v1419_v3  ;;  %v1176_v16 = vld [vmem:[%s1797_s19] sm:$0xf]  ;;  %v1374_v17 = vld [vmem:[%s1797_s19 + $0x4] sm:$0xf0]  ;;  %v1373_v20 = vld [vmem:[%s1797_s19 + $0x4] sm:$0xf] }
  0x2e   : > { %v1240_v18 = vld [vmem:[%s1797_s19 + $0x80] sm:$0xf]  ;;  %v1390_v19 = vld [vmem:[%s1797_s19 + $0x84] sm:$0xf0]  ;;  %v1178_v21 = vld [vmem:[%s1797_s19 + $0x8] sm:$0xf0]  ;;  %v1177_v24 = vor.u32 %v1374_v17, %v1176_v16  ;;  %p1596_p4 = pnand %p1595_p1, %p1771_p3  ;;  %p1601_p11 = por %p1600_p10, %p1599_p9 }
  0x2f   : > { %v1389_v22 = vld [vmem:[%s1797_s19 + $0x84] sm:$0xf]  ;;  %v1242_v23 = vld [vmem:[%s1797_s19 + $0x88] sm:$0xf0]  ;;  %v1241_v25 = vor.u32 %v1390_v19, %v1240_v18  ;;  %v1181_v26 = vor.u32 %v1373_v20, %v1178_v21  ;;  %v1376_v29 = vld [vmem:[%s1797_s19 + $0x14] sm:$0xf0] }
  0x30   : > { %653 = vmatpush.bf16.msra.mxu0 %v1410_v4  ;;  %1424 = vmatpush.bf16.msra.mxu2 %v1410_v4  ;;  %v1245_v27 = vor.u32 %v1389_v22, %v1242_v23  ;;  %v1248_v30 = vld [vmem:[%s1797_s19 + $0x90] sm:$0xf]  ;;  %v1392_v31 = vld [vmem:[%s1797_s19 + $0x94] sm:$0xf0]  ;;  %v1375_v32 = vld [vmem:[%s1797_s19 + $0x14] sm:$0xf]  ;;  %v1185_v36 = vor.u32 %v1376_v29, %v1184_v28  ;;  %p1597_p8 = pneg %p1596_p4 }
  0x31   : > { %742 = vmatpush.bf16.msra.mxu1 %v1418_v5  ;;  %1432 = vmatpush.bf16.msra.mxu3 %v1418_v5  ;;  %v1186_v33 = vld [vmem:[%s1797_s19 + $0x18] sm:$0xf0]  ;;  %v1391_v34 = vld [vmem:[%s1797_s19 + $0x94] sm:$0xf]  ;;  %v1249_v37 = vor.u32 %v1392_v31, %v1248_v30  ;;  %v1192_v40 = vld [vmem:[%s1797_s19 + $0x20] sm:$0xf] }
  0x32   : > { %v1250_v35 = vld [vmem:[%s1797_s19 + $0x98] sm:$0xf0]  ;;  %v1189_v38 = vor.u32 %v1375_v32, %v1186_v33  ;;  %v1378_v41 = vld [vmem:[%s1797_s19 + $0x24] sm:$0xf0]  ;;  %v1256_v42 = vld [vmem:[%s1797_s19 + $0xa0] sm:$0xf]  ;;  %p1602_p12 = pnand %p1601_p11, %p1597_p8 }
  0x33   : > { %v1253_v39 = vor.u32 %v1391_v34, %v1250_v35  ;;  %v1394_v43 = vld [vmem:[%s1797_s19 + $0xa4] sm:$0xf0]  ;;  %v1377_v44 = vld [vmem:[%s1797_s19 + $0x24] sm:$0xf]  ;;  %v1194_v45 = vld [vmem:[%s1797_s19 + $0x28] sm:$0xf0]  ;;  %v1193_v48 = vor.u32 %v1378_v41, %v1192_v40 }
  0x34   : > { %654 = vmatpush.bf16.msra.mxu0 %v1409_v6  ;;  %1425 = vmatpush.bf16.msra.mxu2 %v1409_v6  ;;  %v1393_v46 = vld [vmem:[%s1797_s19 + $0xa4] sm:$0xf]  ;;  %v1258_v47 = vld [vmem:[%s1797_s19 + $0xa8] sm:$0xf0]  ;;  %v1257_v49 = vor.u32 %v1394_v43, %v1256_v42  ;;  %v1197_v50 = vor.u32 %v1377_v44, %v1194_v45  ;;  %v1200_v52 = vld [vmem:[%s1797_s19 + $0x30] sm:$0xf] }
  0x35   : > { %743 = vmatpush.bf16.msra.mxu1 %v1417_v7  ;;  %1433 = vmatpush.bf16.msra.mxu3 %v1417_v7  ;;  %v1261_v51 = vor.u32 %v1393_v46, %v1258_v47  ;;  %v1380_v53 = vld [vmem:[%s1797_s19 + $0x34] sm:$0xf0]  ;;  %v1264_v54 = vld [vmem:[%s1797_s19 + $0xb0] sm:$0xf]  ;;  %v1379_v56 = vld [vmem:[%s1797_s19 + $0x34] sm:$0xf] }
  0x36   : > { %v1396_v55 = vld [vmem:[%s1797_s19 + $0xb4] sm:$0xf0]  ;;  %v1202_v57 = vld [vmem:[%s1797_s19 + $0x38] sm:$0xf0]  ;;  %v1395_v58 = vld [vmem:[%s1797_s19 + $0xb4] sm:$0xf]  ;;  %v1201_v60 = vor.u32 %v1380_v53, %v1200_v52 }
  0x37   : > { %v1266_v59 = vld [vmem:[%s1797_s19 + $0xb8] sm:$0xf0]  ;;  %v1265_v61 = vor.u32 %v1396_v55, %v1264_v54  ;;  %v1205_v62 = vor.u32 %v1379_v56, %v1202_v57  ;;  %v1208_v0 = vld [vmem:[%s1797_s19 + $0x40] sm:$0xf]  ;;  %v1382_v1 = vld [vmem:[%s1797_s19 + $0x44] sm:$0xf0] }
  0x38   : > { %655 = vmatpush.bf16.msra.mxu0 %v1408_v8  ;;  %1426 = vmatpush.bf16.msra.mxu2 %v1408_v8  ;;  %v1269_v63 = vor.u32 %v1395_v58, %v1266_v59  ;;  %v1272_v2 = vld [vmem:[%s1797_s19 + $0xc0] sm:$0xf]  ;;  %v1398_v3 = vld [vmem:[%s1797_s19 + $0xc4] sm:$0xf0]  ;;  %v1381_v4 = vld [vmem:[%s1797_s19 + $0x44] sm:$0xf]  ;;  %v1209_v8 = vor.u32 %v1382_v1, %v1208_v0 }
  0x39   : > { %744 = vmatpush.bf16.msra.mxu1 %v1416_v9  ;;  %1434 = vmatpush.bf16.msra.mxu3 %v1416_v9  ;;  %v1210_v5 = vld [vmem:[%s1797_s19 + $0x48] sm:$0xf0]  ;;  %v1397_v6 = vld [vmem:[%s1797_s19 + $0xc4] sm:$0xf]  ;;  %v1273_v9 = vor.u32 %v1398_v3, %v1272_v2  ;;  %v1383_v16 = vld [vmem:[%s1797_s19 + $0x54] sm:$0xf] }
  0x3a   : > { %v1274_v7 = vld [vmem:[%s1797_s19 + $0xc8] sm:$0xf0]  ;;  %v1218_v17 = vld [vmem:[%s1797_s19 + $0x58] sm:$0xf0]  ;;  %v1399_v18 = vld [vmem:[%s1797_s19 + $0xd4] sm:$0xf] }
  0x3b   : > { %v1282_v19 = vld [vmem:[%s1797_s19 + $0xd8] sm:$0xf0]  ;;  %v1221_v22 = vor.u32 %v1383_v16, %v1218_v17  ;;  %v1385_v28 = vld [vmem:[%s1797_s19 + $0x64] sm:$0xf]  ;;  %v1226_v29 = vld [vmem:[%s1797_s19 + $0x68] sm:$0xf0] }
  0x3c   : > { %656 = vmatpush.bf16.msra.mxu0 %v1407_v10  ;;  %1427 = vmatpush.bf16.msra.mxu2 %v1407_v10  ;;  %v1213_v10 = vor.u32 %v1381_v4, %v1210_v5  ;;  %v1285_v23 = vor.u32 %v1399_v18, %v1282_v19  ;;  %v1401_v30 = vld [vmem:[%s1797_s19 + $0xe4] sm:$0xf]  ;;  %v1290_v31 = vld [vmem:[%s1797_s19 + $0xe8] sm:$0xf0]  ;;  %v1229_v34 = vor.u32 %v1385_v28, %v1226_v29  ;;  %v1387_v40 = vld [vmem:[%s1797_s19 + $0x74] sm:$0xf] }
  0x3d   : > { %745 = vmatpush.bf16.msra.mxu1 %v1415_v11  ;;  %1435 = vmatpush.bf16.msra.mxu3 %v1415_v11  ;;  %v1277_v11 = vor.u32 %v1397_v6, %v1274_v7  ;;  %v1293_v35 = vor.u32 %v1401_v30, %v1290_v31  ;;  %v1234_v41 = vld [vmem:[%s1797_s19 + $0x78] sm:$0xf0]  ;;  %v1403_v42 = vld [vmem:[%s1797_s19 + $0xf4] sm:$0xf] }
  0x3e   : > { %v1298_v43 = vld [vmem:[%s1797_s19 + $0xf8] sm:$0xf0]  ;;  %v1237_v46 = vor.u32 %v1387_v40, %v1234_v41 }
  0x3f   : > { %v1301_v47 = vor.u32 %v1403_v42, %v1298_v43 }
  0x40   : > { %657 = vmatpush.bf16.msra.mxu0 %v1406_v12  ;;  %1428 = vmatpush.bf16.msra.mxu2 %v1406_v12  ;;  %v1216_v12 = vld [vmem:[%s1797_s19 + $0x50] sm:$0xf] }
  0x41   : > { %746 = vmatpush.bf16.msra.mxu1 %v1414_v13  ;;  %1436 = vmatpush.bf16.msra.mxu3 %v1414_v13  ;;  %v1384_v13 = vld [vmem:[%s1797_s19 + $0x54] sm:$0xf0] }
  0x42   : > { %v1217_v20 = vor.u32 %v1384_v13, %v1216_v12 }
  0x44   : > { %658 = vmatpush.bf16.msra.mxu0 %v1405_v14  ;;  %1429 = vmatpush.bf16.msra.mxu2 %v1405_v14  ;;  %v1280_v14 = vld [vmem:[%s1797_s19 + $0xd0] sm:$0xf] }
  0x45   : > { %747 = vmatpush.bf16.msra.mxu1 %v1413_v15  ;;  %1437 = vmatpush.bf16.msra.mxu3 %v1413_v15  ;;  %v1400_v15 = vld [vmem:[%s1797_s19 + $0xd4] sm:$0xf0] }
  0x46   : > { %v1281_v21 = vor.u32 %v1400_v15, %v1280_v14 }
  0x47   : > { %659 = vmatmul.bf16.vlgmr.msra.gmra.mxu0 %v1177_v24  ;;  %699 = vmatmul.bf16.vlgmr.msra.gmra.mxu2 %v1241_v25  ;;  %v1224_v24 = vld [vmem:[%s1797_s19 + $0x60] sm:$0xf]  ;;  %v1386_v25 = vld [vmem:[%s1797_s19 + $0x64] sm:$0xf0] }
  0x48   : > { %748 = vmatmul.bf16.vlgmr.msra.gmra.mxu1 %v1181_v26  ;;  %788 = vmatmul.bf16.vlgmr.msra.gmra.mxu3 %v1245_v27  ;;  %v1288_v26 = vld [vmem:[%s1797_s19 + $0xe0] sm:$0xf]  ;;  %v1402_v27 = vld [vmem:[%s1797_s19 + $0xe4] sm:$0xf0]  ;;  %v1225_v32 = vor.u32 %v1386_v25, %v1224_v24 }
  0x49   : > { %v1289_v33 = vor.u32 %v1402_v27, %v1288_v26 }
  0x57   : > { %664 = vmatmul.bf16.gmra.mxu0 %v1185_v36  ;;  %704 = vmatmul.bf16.gmra.mxu2 %v1249_v37  ;;  %v1232_v36 = vld [vmem:[%s1797_s19 + $0x70] sm:$0xf]  ;;  %v1388_v37 = vld [vmem:[%s1797_s19 + $0x74] sm:$0xf0] }
  0x58   : > { %753 = vmatmul.bf16.gmra.mxu1 %v1189_v38  ;;  %793 = vmatmul.bf16.gmra.mxu3 %v1253_v39  ;;  %v1296_v38 = vld [vmem:[%s1797_s19 + $0xf0] sm:$0xf]  ;;  %v1404_v39 = vld [vmem:[%s1797_s19 + $0xf4] sm:$0xf0]  ;;  %v1233_v44 = vor.u32 %v1388_v37, %v1232_v36 }
  0x59   : > { %v1297_v45 = vor.u32 %v1404_v39, %v1296_v38 }
  0x67   : > { %669 = vmatmul.bf16.gmra.mxu0 %v1193_v48  ;;  %709 = vmatmul.bf16.gmra.mxu2 %v1257_v49  ;;  %v1874_v49 = vld [vmem:[%s1984_s2] ss:$0 sm:$0xff] }
  0x68   : > { %758 = vmatmul.bf16.gmra.mxu1 %v1197_v50  ;;  %798 = vmatmul.bf16.gmra.mxu3 %v1261_v51 }
  0x77   : > { %674 = vmatmul.bf16.gmra.mxu0 %v1201_v60  ;;  %714 = vmatmul.bf16.gmra.mxu2 %v1265_v61 }
  0x78   : > { %763 = vmatmul.bf16.gmra.mxu1 %v1205_v62  ;;  %803 = vmatmul.bf16.gmra.mxu3 %v1269_v63 }
  0x87   : > { %679 = vmatmul.bf16.gmra.mxu0 %v1209_v8  ;;  %719 = vmatmul.bf16.gmra.mxu2 %v1273_v9 }
  0x88   : > { %768 = vmatmul.bf16.gmra.mxu1 %v1213_v10  ;;  %808 = vmatmul.bf16.gmra.mxu3 %v1277_v11 }
  0x97   : > { %684 = vmatmul.bf16.gmra.mxu0 %v1217_v20  ;;  %724 = vmatmul.bf16.gmra.mxu2 %v1281_v21 }
  0x98   : > { %773 = vmatmul.bf16.gmra.mxu1 %v1221_v22  ;;  %813 = vmatmul.bf16.gmra.mxu3 %v1285_v23 }
  0xa7   : > { %689 = vmatmul.bf16.gmra.mxu0 %v1225_v32  ;;  %729 = vmatmul.bf16.gmra.mxu2 %v1289_v33 }
  0xa8   : > { %778 = vmatmul.bf16.gmra.mxu1 %v1229_v34  ;;  %818 = vmatmul.bf16.gmra.mxu3 %v1293_v35 }
  0xb7   : > { %694 = vmatmul.bf16.gmra.mxu0 %v1233_v44  ;;  %734 = vmatmul.bf16.gmra.mxu2 %v1297_v45 }
  0xb8   : > { %783 = vmatmul.bf16.gmra.mxu1 %v1237_v46  ;;  %823 = vmatmul.bf16.gmra.mxu3 %v1301_v47 }
  0xc4   : > { %v660_v48 = vpop.f32.mrf.mxu0 }
  0xc5   : > { %v749_v50 = vpop.f32.mrf.mxu1 }
  0xc6   : > { %v750_v51 = vadd.f32 %v749_v50, %v660_v48 }
  0xc8   : > { %v932_v52 = vadd.f32 %v1874_v49, %v750_v51 }
  0xca   : > { %v964_v53 = vmax.f32 %v932_v52, 0.0  ;;  %v700_v54 = vpop.f32.mrf.mxu2 }
  0xcb   : > { %v789_v55 = vpop.f32.mrf.mxu3 }
  0xcc   : > { %996 = vst [vmem:[%s1879_s22] sm:$0xff] %v964_v53  ;;  %v790_v56 = vadd.f32 %v789_v55, %v700_v54  ;;  %v662_v57 = vpop.f32.mrf.mxu0 }
  0xcd   : > { %v751_v58 = vpop.f32.mrf.mxu1 }
  0xce   : > { %v948_v59 = vadd.f32 %v1874_v49, %v790_v56  ;;  %v752_v60 = vadd.f32 %v751_v58, %v662_v57 }
  0xd0   : > { %v980_v61 = vmax.f32 %v948_v59, 0.0  ;;  %v933_v62 = vadd.f32 %v1874_v49, %v752_v60 }
  0xd2   : > { %1012 = vst [vmem:[%s1879_s22 + $0x80] sm:$0xff] %v980_v61  ;;  %v965_v63 = vmax.f32 %v933_v62, 0.0  ;;  %v702_v0 = vpop.f32.mrf.mxu2 }
  0xd3   : > { %v791_v1 = vpop.f32.mrf.mxu3 }
  0xd4   : > { %997 = vst [vmem:[%s1879_s22 + $0x8] sm:$0xff] %v965_v63  ;;  %v792_v2 = vadd.f32 %v791_v1, %v702_v0  ;;  %v665_v3 = vpop.f32.mrf.mxu0 }
  0xd5   : > { %v754_v4 = vpop.f32.mrf.mxu1 }
  0xd6   : > { %v949_v5 = vadd.f32 %v1874_v49, %v792_v2  ;;  %v755_v6 = vadd.f32 %v754_v4, %v665_v3 }
  0xd8   : > { %v981_v7 = vmax.f32 %v949_v5, 0.0  ;;  %v934_v8 = vadd.f32 %v1874_v49, %v755_v6 }
  0xda   : > { %1013 = vst [vmem:[%s1879_s22 + $0x88] sm:$0xff] %v981_v7  ;;  %v966_v9 = vmax.f32 %v934_v8, 0.0  ;;  %v705_v10 = vpop.f32.mrf.mxu2 }
  0xdb   : > { %v794_v11 = vpop.f32.mrf.mxu3 }
  0xdc   : > { %998 = vst [vmem:[%s1879_s22 + $0x10] sm:$0xff] %v966_v9  ;;  %v795_v12 = vadd.f32 %v794_v11, %v705_v10  ;;  %v667_v13 = vpop.f32.mrf.mxu0 }
  0xdd   : > { %v756_v14 = vpop.f32.mrf.mxu1 }
  0xde   : > { %v950_v15 = vadd.f32 %v1874_v49, %v795_v12  ;;  %v757_v16 = vadd.f32 %v756_v14, %v667_v13 }
  0xe0   : > { %v982_v17 = vmax.f32 %v950_v15, 0.0  ;;  %v935_v18 = vadd.f32 %v1874_v49, %v757_v16 }
  0xe2   : > { %1014 = vst [vmem:[%s1879_s22 + $0x90] sm:$0xff] %v982_v17  ;;  %v967_v19 = vmax.f32 %v935_v18, 0.0  ;;  %v707_v20 = vpop.f32.mrf.mxu2 }
  0xe3   : > { %v796_v21 = vpop.f32.mrf.mxu3 }
  0xe4   : > { %999 = vst [vmem:[%s1879_s22 + $0x18] sm:$0xff] %v967_v19  ;;  %v797_v22 = vadd.f32 %v796_v21, %v707_v20  ;;  %v670_v23 = vpop.f32.mrf.mxu0 }
  0xe5   : > { %v759_v24 = vpop.f32.mrf.mxu1 }
  0xe6   : > { %v951_v25 = vadd.f32 %v1874_v49, %v797_v22  ;;  %v760_v26 = vadd.f32 %v759_v24, %v670_v23 }
  0xe8   : > { %v983_v27 = vmax.f32 %v951_v25, 0.0  ;;  %v936_v28 = vadd.f32 %v1874_v49, %v760_v26 }
  0xea   : > { %1015 = vst [vmem:[%s1879_s22 + $0x98] sm:$0xff] %v983_v27  ;;  %v968_v29 = vmax.f32 %v936_v28, 0.0  ;;  %v710_v30 = vpop.f32.mrf.mxu2 }
  0xeb   : > { %v799_v31 = vpop.f32.mrf.mxu3 }
  0xec   : > { %1000 = vst [vmem:[%s1879_s22 + $0x20] sm:$0xff] %v968_v29  ;;  %v800_v32 = vadd.f32 %v799_v31, %v710_v30  ;;  %v672_v33 = vpop.f32.mrf.mxu0 }
  0xed   : > { %v761_v34 = vpop.f32.mrf.mxu1 }
  0xee   : > { %v952_v35 = vadd.f32 %v1874_v49, %v800_v32  ;;  %v762_v36 = vadd.f32 %v761_v34, %v672_v33 }
  0xf0   : > { %v984_v37 = vmax.f32 %v952_v35, 0.0  ;;  %v937_v38 = vadd.f32 %v1874_v49, %v762_v36 }
  0xf2   : > { %1016 = vst [vmem:[%s1879_s22 + $0xa0] sm:$0xff] %v984_v37  ;;  %v969_v39 = vmax.f32 %v937_v38, 0.0  ;;  %v712_v40 = vpop.f32.mrf.mxu2 }
  0xf3   : > { %v801_v41 = vpop.f32.mrf.mxu3 }
  0xf4   : > { %1001 = vst [vmem:[%s1879_s22 + $0x28] sm:$0xff] %v969_v39  ;;  %v802_v42 = vadd.f32 %v801_v41, %v712_v40  ;;  %v675_v43 = vpop.f32.mrf.mxu0 }
  0xf5   : > { %v764_v44 = vpop.f32.mrf.mxu1 }
  0xf6   : > { %v953_v45 = vadd.f32 %v1874_v49, %v802_v42  ;;  %v765_v46 = vadd.f32 %v764_v44, %v675_v43 }
  0xf8   : > { %v985_v47 = vmax.f32 %v953_v45, 0.0  ;;  %v938_v48 = vadd.f32 %v1874_v49, %v765_v46 }
  0xfa   : > { %1017 = vst [vmem:[%s1879_s22 + $0xa8] sm:$0xff] %v985_v47  ;;  %v970_v50 = vmax.f32 %v938_v48, 0.0  ;;  %v715_v51 = vpop.f32.mrf.mxu2 }
  0xfb   : > { %v804_v52 = vpop.f32.mrf.mxu3 }
  0xfc   : > { %1002 = vst [vmem:[%s1879_s22 + $0x30] sm:$0xff] %v970_v50  ;;  %v805_v53 = vadd.f32 %v804_v52, %v715_v51  ;;  %v677_v54 = vpop.f32.mrf.mxu0 }
  0xfd   : > { %v766_v55 = vpop.f32.mrf.mxu1 }
  0xfe   : > { %v954_v56 = vadd.f32 %v1874_v49, %v805_v53  ;;  %v767_v57 = vadd.f32 %v766_v55, %v677_v54 }
 0x100   : > { %v986_v58 = vmax.f32 %v954_v56, 0.0  ;;  %v939_v59 = vadd.f32 %v1874_v49, %v767_v57 }
 0x102   : > { %1018 = vst [vmem:[%s1879_s22 + $0xb0] sm:$0xff] %v986_v58  ;;  %v971_v60 = vmax.f32 %v939_v59, 0.0  ;;  %v717_v61 = vpop.f32.mrf.mxu2 }
 0x103   : > { %v806_v62 = vpop.f32.mrf.mxu3 }
 0x104   : > { %1003 = vst [vmem:[%s1879_s22 + $0x38] sm:$0xff] %v971_v60  ;;  %v807_v63 = vadd.f32 %v806_v62, %v717_v61  ;;  %v680_v0 = vpop.f32.mrf.mxu0 }
 0x105   : > { %v769_v1 = vpop.f32.mrf.mxu1 }
 0x106   : > { %v955_v2 = vadd.f32 %v1874_v49, %v807_v63  ;;  %v770_v3 = vadd.f32 %v769_v1, %v680_v0 }
 0x108   : > { %v987_v4 = vmax.f32 %v955_v2, 0.0  ;;  %v940_v5 = vadd.f32 %v1874_v49, %v770_v3 }
 0x10a   : > { %1019 = vst [vmem:[%s1879_s22 + $0xb8] sm:$0xff] %v987_v4  ;;  %v972_v6 = vmax.f32 %v940_v5, 0.0  ;;  %v720_v7 = vpop.f32.mrf.mxu2 }
 0x10b   : > { %v809_v8 = vpop.f32.mrf.mxu3 }
 0x10c   : > { %1004 = vst [vmem:[%s1879_s22 + $0x40] sm:$0xff] %v972_v6  ;;  %v810_v9 = vadd.f32 %v809_v8, %v720_v7  ;;  %v682_v10 = vpop.f32.mrf.mxu0 }
 0x10d   : > { %v771_v11 = vpop.f32.mrf.mxu1 }
 0x10e   : > { %v956_v12 = vadd.f32 %v1874_v49, %v810_v9  ;;  %v772_v13 = vadd.f32 %v771_v11, %v682_v10 }
 0x110   : > { %v988_v14 = vmax.f32 %v956_v12, 0.0  ;;  %v941_v15 = vadd.f32 %v1874_v49, %v772_v13 }
 0x112   : > { %1020 = vst [vmem:[%s1879_s22 + $0xc0] sm:$0xff] %v988_v14  ;;  %v973_v16 = vmax.f32 %v941_v15, 0.0  ;;  %v722_v17 = vpop.f32.mrf.mxu2 }
 0x113   : > { %v811_v18 = vpop.f32.mrf.mxu3 }
 0x114   : > { %1005 = vst [vmem:[%s1879_s22 + $0x48] sm:$0xff] %v973_v16  ;;  %v812_v19 = vadd.f32 %v811_v18, %v722_v17  ;;  %v685_v20 = vpop.f32.mrf.mxu0 }
 0x115   : > { %v774_v21 = vpop.f32.mrf.mxu1 }
 0x116   : > { %v957_v22 = vadd.f32 %v1874_v49, %v812_v19  ;;  %v775_v23 = vadd.f32 %v774_v21, %v685_v20 }
 0x118   : > { %v989_v24 = vmax.f32 %v957_v22, 0.0  ;;  %v942_v25 = vadd.f32 %v1874_v49, %v775_v23 }
 0x11a   : > { %1021 = vst [vmem:[%s1879_s22 + $0xc8] sm:$0xff] %v989_v24  ;;  %v974_v26 = vmax.f32 %v942_v25, 0.0  ;;  %v725_v27 = vpop.f32.mrf.mxu2 }
 0x11b   : > { %v814_v28 = vpop.f32.mrf.mxu3 }
 0x11c   : > { %1006 = vst [vmem:[%s1879_s22 + $0x50] sm:$0xff] %v974_v26  ;;  %v815_v29 = vadd.f32 %v814_v28, %v725_v27  ;;  %v687_v30 = vpop.f32.mrf.mxu0 }
 0x11d   : > { %v776_v31 = vpop.f32.mrf.mxu1 }
 0x11e   : > { %v958_v32 = vadd.f32 %v1874_v49, %v815_v29  ;;  %v777_v33 = vadd.f32 %v776_v31, %v687_v30 }
 0x120   : > { %v990_v34 = vmax.f32 %v958_v32, 0.0  ;;  %v943_v35 = vadd.f32 %v1874_v49, %v777_v33 }
 0x122   : > { %1022 = vst [vmem:[%s1879_s22 + $0xd0] sm:$0xff] %v990_v34  ;;  %v975_v36 = vmax.f32 %v943_v35, 0.0  ;;  %v727_v37 = vpop.f32.mrf.mxu2 }
 0x123   : > { %v816_v38 = vpop.f32.mrf.mxu3 }
 0x124   : > { %1007 = vst [vmem:[%s1879_s22 + $0x58] sm:$0xff] %v975_v36  ;;  %v817_v39 = vadd.f32 %v816_v38, %v727_v37  ;;  %v690_v40 = vpop.f32.mrf.mxu0 }
 0x125   : > { %v779_v41 = vpop.f32.mrf.mxu1 }
 0x126   : > { %v959_v42 = vadd.f32 %v1874_v49, %v817_v39  ;;  %v780_v43 = vadd.f32 %v779_v41, %v690_v40 }
 0x128   : > { %v991_v44 = vmax.f32 %v959_v42, 0.0  ;;  %v944_v45 = vadd.f32 %v1874_v49, %v780_v43 }
 0x12a   : > { %1023 = vst [vmem:[%s1879_s22 + $0xd8] sm:$0xff] %v991_v44  ;;  %v976_v46 = vmax.f32 %v944_v45, 0.0  ;;  %v730_v47 = vpop.f32.mrf.mxu2 }
 0x12b   : > { %v819_v48 = vpop.f32.mrf.mxu3 }
 0x12c   : > { %1008 = vst [vmem:[%s1879_s22 + $0x60] sm:$0xff] %v976_v46  ;;  %v820_v50 = vadd.f32 %v819_v48, %v730_v47  ;;  %v692_v51 = vpop.f32.mrf.mxu0 }
 0x12d   : > { %v781_v52 = vpop.f32.mrf.mxu1 }
 0x12e   : > { %v960_v53 = vadd.f32 %v1874_v49, %v820_v50  ;;  %v782_v54 = vadd.f32 %v781_v52, %v692_v51 }
 0x130   : > { %v992_v55 = vmax.f32 %v960_v53, 0.0  ;;  %v945_v56 = vadd.f32 %v1874_v49, %v782_v54 }
 0x132   : > { %1024 = vst [vmem:[%s1879_s22 + $0xe0] sm:$0xff] %v992_v55  ;;  %v977_v57 = vmax.f32 %v945_v56, 0.0  ;;  %v732_v58 = vpop.f32.mrf.mxu2 }
 0x133   : > { %v821_v59 = vpop.f32.mrf.mxu3 }
 0x134   : > { %1009 = vst [vmem:[%s1879_s22 + $0x68] sm:$0xff] %v977_v57  ;;  %v822_v60 = vadd.f32 %v821_v59, %v732_v58  ;;  %v695_v61 = vpop.f32.mrf.mxu0 }
 0x135   : > { %v784_v62 = vpop.f32.mrf.mxu1 }
 0x136   : > { %v961_v63 = vadd.f32 %v1874_v49, %v822_v60  ;;  %v785_v0 = vadd.f32 %v784_v62, %v695_v61 }
 0x138   : > { %v993_v1 = vmax.f32 %v961_v63, 0.0  ;;  %v946_v2 = vadd.f32 %v1874_v49, %v785_v0 }
 0x13a   : > { %1025 = vst [vmem:[%s1879_s22 + $0xe8] sm:$0xff] %v993_v1  ;;  %v978_v3 = vmax.f32 %v946_v2, 0.0  ;;  %v735_v4 = vpop.f32.mrf.mxu2 }
 0x13b   : > { %v824_v5 = vpop.f32.mrf.mxu3 }
 0x13c   : > { %1010 = vst [vmem:[%s1879_s22 + $0x70] sm:$0xff] %v978_v3  ;;  %v825_v6 = vadd.f32 %v824_v5, %v735_v4  ;;  %v697_v7 = vpop.f32.mrf.mxu0 }
 0x13d   : > { %v786_v8 = vpop.f32.mrf.mxu1 }
 0x13e   : > { %v962_v9 = vadd.f32 %v1874_v49, %v825_v6  ;;  %v787_v10 = vadd.f32 %v786_v8, %v697_v7 }
 0x140   : > { %v994_v11 = vmax.f32 %v962_v9, 0.0  ;;  %v947_v12 = vadd.f32 %v1874_v49, %v787_v10 }
 0x142   : > { %1026 = vst [vmem:[%s1879_s22 + $0xf0] sm:$0xff] %v994_v11  ;;  %v979_v13 = vmax.f32 %v947_v12, 0.0  ;;  %v737_v14 = vpop.f32.mrf.mxu2 }
 0x143   : > { %v826_v15 = vpop.f32.mrf.mxu3 }
 0x144   : > { %1011 = vst [vmem:[%s1879_s22 + $0x78] sm:$0xff] %v979_v13  ;;  %v827_v16 = vadd.f32 %v826_v15, %v737_v14 }
 0x146   : > { %v963_v17 = vadd.f32 %v1874_v49, %v827_v16 }
 0x148   : > { %v995_v18 = vmax.f32 %v963_v17, 0.0 }
 0x14a   : > { %1027 = vst [vmem:[%s1879_s22 + $0xf8] sm:$0xff] %v995_v18 }
 0x14b   : > { %1605 = shalt.err (!%p1602_p12)
}
 0x14c   : > { %s1671_s6 = smov 128   ;;  %s1672_s19 = smov 8  }
 0x14d   : > { %1444 = dma.vmem_to_hbm [thread:$0]  (%p1771_p3), %s1043_s25, 4096, %s1045_s26, %s1029_s15, %s1671_s6, %s1671_s6, %s1672_s19  }
 0x14e PF: > { %p1461_p13 = scmp.ge.s32.totalorder %s1664_s17, 2  ;;  %s1059_s1 = sand.u32 1, %s1644_s12  }
 0x14f   : > { %s1060_s20 = scalar_lea.sflag [#allocation5], %s1059_s1 }
 0x150   : > { %p1455_p0 = pnand %p1461_p13, %p1742_p6 }
 0x152   : > { %p1456_p5 = pneg %p1455_p0 }
 0x154   : > { %1639 = dma.done.wait (%p1456_p5), %s1060_s20, 4096  }
 0x155   : > { %1641 = vsyncadd (%p1456_p5), %s1060_s20, 4294963200  ;;  %s20_s17 = sadd.s32 1, %s1664_s17   ;;  %s1995_s12 = smov %s1648_s13 }
 0x156   : > { %p17_p7 = scmp.ge.s32.totalorder %s20_s17, 10   ;;  %s1996_s13 = smov %s1652_s14 }
 0x157   : > { %s1997_s14 = smov %s1780_s18  ;;  %s1998_s15 = smov %s1660_s16 }
 0x158   : > { %s1999_s16 = smov %s2001_s5  ;;  %19 = sbr.rel (!%p17_p7) target bundleno = 9 (0x9), region = 93 }
 0x15d   :  { %1066 = vsyncpa [#allocation4], 1 }
 0x15e   :  { %1068 = vsyncpa [#allocation4 + $0x1], 1 }
 0x15f   :  { %1069 = vsyncpa [#allocation7], 1 }
 0x160   :  { %1070 = vsyncpa [#allocation5], 1 }
 0x161   :  { %1072 = vsyncpa [#allocation5 + $0x1], 1 }

</bundles_post_ra>
